<compile_context>
chip_gen: v6e
topology: v6e:2x2x1
jax: 0.10.0
libtpu: 0.0.40
codegen_flags: <defaults>
</compile_context>

<pallas_src>
import math

import jax
import jax.numpy as jnp
from jax.experimental import pallas as pl
from jax.experimental.pallas import tpu as pltpu


def _pair(v):
    return (v, v) if isinstance(v, int) else tuple(v)


def _same_pad_amounts(kernel_size, stride, in_width, in_height):
    """Exactly mirrors SamePad2d.forward's arithmetic.

    in_width  = input dim 2, uses stride[0]/kernel_size[0] -> (pad_left, pad_right)
    in_height = input dim 3, uses stride[1]/kernel_size[1] -> (pad_top, pad_bottom)
    F.pad then applies (pad_left, pad_right) to dim 3 and (pad_top, pad_bottom)
    to dim 2 — the module's intentional width/height swap.
    """
    k = _pair(kernel_size)
    s = _pair(stride)
    out_width = math.ceil(float(in_width) / float(s[0]))
    out_height = math.ceil(float(in_height) / float(s[1]))
    pad_along_width = (out_width - 1) * s[0] + k[0] - in_width
    pad_along_height = (out_height - 1) * s[1] + k[1] - in_height
    pad_left = int(math.floor(pad_along_width / 2))
    pad_top = int(math.floor(pad_along_height / 2))
    pad_right = int(pad_along_width - pad_left)
    pad_bottom = int(pad_along_height - pad_top)
    return pad_left, pad_right, pad_top, pad_bottom


def _sublane(dtype):
    """Sublane packing for a dtype: 8 for 4-byte, 16 for 2-byte, 32 for 1-byte."""
    itemsize = int(jnp.dtype(dtype).itemsize)
    return max(8, 32 // max(itemsize, 1))


def _padded_block_bytes(c_blk, lanes, dtype):
    """Real VMEM footprint of a (1, c_blk, lanes) block: VMEM stores
    (sublane, 128)-tiled data, so both minor dims round up."""
    sub = _sublane(dtype)
    itemsize = int(jnp.dtype(dtype).itemsize)
    c_pad = -(-c_blk // sub) * sub
    l_pad = -(-lanes // 128) * 128
    return c_pad * l_pad * itemsize


def _vmem_budget_and_limit():
    """Per-generation (block-footprint budget, vmem_limit_bytes).
    v7x has 64 MiB VMEM per TensorCore; v5e/v6e have 128 MiB."""
    phys = None
    try:
        phys = getattr(pltpu.get_tpu_info(), "vmem_capacity_bytes", None)
    except Exception:
        phys = None
    if phys is None or phys <= 64 * 1024 * 1024:      # v7x, or unknown: conservative
        return 20 * 1024 * 1024, 48 * 1024 * 1024
    return 40 * 1024 * 1024, 96 * 1024 * 1024          # v5e / v6e


def _choose_c_block(N, C, lanes_in, lanes_out, dtype, budget_bytes,
                    min_grid_steps=4):
    """Largest layout-legal channel block (divides C; multiple of the sublane
    count or equal to C) whose double-buffered in+out blocks fit the budget,
    preferring at least `min_grid_steps` grid steps so v7x's two TensorCores
    both get work and the pipeline overlaps input DMA with output writeback.
    Returns None if even the smallest legal block does not fit."""
    sub = _sublane(dtype)
    divisors = [d for d in range(1, C + 1)
                if C % d == 0 and (d == C or d % sub == 0)]
    divisors.sort(reverse=True)

    def footprint(d):
        return 2 * (_padded_block_bytes(d, lanes_in, dtype) +
                    _padded_block_bytes(d, lanes_out, dtype))

    fits = [d for d in divisors if footprint(d) <= budget_bytes]
    if not fits:
        return None
    for d in fits:                       # descending: largest block first
        if N * (C // d) >= min_grid_steps:
            return d
    return fits[0]                       # grid is small everywhere; take biggest block


def _make_pad_kernel(pad_top, pad_left, H, W, W_out):
    """Kernel body for flattened (…, H*W) -> (…, H_out*W_out) padding.
    Zero-fill the whole output block once (free slack in a DMA-bound kernel),
    then one static lane-slice store per input row into the interior window."""
    def pad_kernel(x_ref, o_ref):
        o_ref[...] = jnp.zeros(o_ref.shape, o_ref.dtype)
        # Static unroll: H is a small CNN feature-map height in this model.
        for h in range(H):
            dst = (pad_top + h) * W_out + pad_left
            o_ref[:, :, dst:dst + W] = x_ref[:, :, h * W:(h + 1) * W]
    return pad_kernel


def same_pad_2d(x, kernel_size, stride, *, min_pallas_bytes=1 << 20):
    """JAX equivalent of SamePad2d(kernel_size, stride)(x) for NCHW x.

    min_pallas_bytes: below this padded-output size the wrapper just returns
    jnp.pad (pallas_call launch overhead dominates tiny tensors and XLA fuses
    the pad into the consumer). Set to 0 to force the Pallas kernel (tests).
    """
    N, C, H, W = x.shape
    pad_left, pad_right, pad_top, pad_bottom = _same_pad_amounts(
        kernel_size, stride, in_width=H, in_height=W)

    # F.pad semantics: negative padding crops from that side. Apply crops
    # wrapper-side (plain slicing, fused by XLA); only non-negative pads
    # reach the kernel.
    crop_t, crop_b = max(0, -pad_top), max(0, -pad_bottom)
    crop_l, crop_r = max(0, -pad_left), max(0, -pad_right)
    if crop_t or crop_b or crop_l or crop_r:
        x = x[:, :, crop_t:H - crop_b, crop_l:W - crop_r]
        N, C, H, W = x.shape
    pad_top, pad_bottom = max(0, pad_top), max(0, pad_bottom)
    pad_left, pad_right = max(0, pad_left), max(0, pad_right)

    # Nothing to pad -> avoid an HBM read+write pass entirely.
    if pad_top == 0 and pad_bottom == 0 and pad_left == 0 and pad_right == 0:
        return x

    H_out = H + pad_top + pad_bottom    # dim 2 padded by (pad_top, pad_bottom)
    W_out = W + pad_left + pad_right    # dim 3 padded by (pad_left, pad_right)
    pads = ((0, 0), (0, 0), (pad_top, pad_bottom), (pad_left, pad_right))

    itemsize = int(jnp.dtype(x.dtype).itemsize)
    if N * C * H_out * W_out * itemsize < min_pallas_bytes:
        # Tiny tensor: let XLA fuse the pad into the consumer.
        return jnp.pad(x, pads)

    lanes_in, lanes_out = H * W, H_out * W_out
    budget, vmem_limit = _vmem_budget_and_limit()
    c_blk = _choose_c_block(N, C, lanes_in, lanes_out, x.dtype, budget)
    if c_blk is None:
        # Even the smallest legal channel block overflows the VMEM budget
        # (enormous spatial planes): fall back to XLA.
        # TODO(synk): add spatial (row-block) tiling if that regime matters.
        return jnp.pad(x, pads)

    kernel = _make_pad_kernel(pad_top, pad_left, H, W, W_out)

    out_flat = pl.pallas_call(
        kernel,
        out_shape=jax.ShapeDtypeStruct((N, C, lanes_out), x.dtype),
        grid=(N, C // c_blk),
        # Last block dim equals the full (flattened) array dim, and c_blk is a
        # sublane multiple or equals C, so the (8, 128) rule is satisfied.
        in_specs=[pl.BlockSpec((1, c_blk, lanes_in), lambda n, c: (n, c, 0))],
        out_specs=pl.BlockSpec((1, c_blk, lanes_out), lambda n, c: (n, c, 0)),
        compiler_params=pltpu.CompilerParams(
            dimension_semantics=("parallel", "parallel"),
            vmem_limit_bytes=vmem_limit,
        ),
    )(x.reshape(N, C, lanes_in))

    return out_flat.reshape(N, C, H_out, W_out)


if __name__ == "__main__":
    keys = jax.random.split(jax.random.PRNGKey(0), 2)

    # Test 1: square input, kernel=3, stride=1 — forced through the Pallas path.
    x1 = jax.random.normal(keys[0], (2, 4, 16, 16), dtype=jnp.float32)
    out1 = jax.block_until_ready(same_pad_2d(x1, 3, 1, min_pallas_bytes=0))
    pl_, pr_, pt_, pb_ = _same_pad_amounts(3, 1, x1.shape[2], x1.shape[3])
    ref1 = jnp.pad(x1, ((0, 0), (0, 0), (pt_, pb_), (pl_, pr_)))
    assert out1.shape == ref1.shape, (out1.shape, ref1.shape)
    assert jnp.array_equal(out1, ref1)

    # Test 2: non-square input + asymmetric kernel/stride — exercises the
    # module's intentional width/height swap (pads derived from dim 2 applied
    # to dim 3 and vice versa). Forced through the Pallas path.
    k2, s2 = (3, 2), (2, 1)
    x2 = jax.random.normal(keys[1], (2, 4, 15, 10), dtype=jnp.float32)
    out2 = jax.block_until_ready(same_pad_2d(x2, k2, s2, min_pallas_bytes=0))
    pl2, pr2, pt2, pb2 = _same_pad_amounts(k2, s2, x2.shape[2], x2.shape[3])
    ref2 = jnp.pad(x2, ((0, 0), (0, 0), (pt2, pb2), (pl2, pr2)))
    assert out2.shape == ref2.shape, (out2.shape, ref2.shape)
    assert jnp.array_equal(out2, ref2)

    # Test 3: default small-tensor bypass (jnp.pad path) agrees with the kernel.
    out3 = jax.block_until_ready(same_pad_2d(x1, 3, 1))
    assert jnp.array_equal(out3, ref1)

    print("KERNEL_OK")
</pallas_src>

<mosaic_0001>
module attributes {stable_mosaic.version = 11 : i64} {
  func.func @pad_kernel(%arg0: i32, %arg1: i32, %arg2: memref<1x4x256xf32, #tpu.memory_space<vmem>>, %arg3: memref<1x4x324xf32, #tpu.memory_space<vmem>>) attributes {dimension_semantics = [#tpu.dimension_semantics<parallel>, #tpu.dimension_semantics<parallel>], iteration_bounds = array<i64: 2, 1>, scalar_prefetch = 0 : i64, scratch_operands = 0 : i64, tpu.core_type = #tpu.core_type<tc>, window_params = [{transform_indices = @transform_0, window_bounds = array<i64: 1, 4, 256>}, {transform_indices = @transform_1, window_bounds = array<i64: 1, 4, 324>}]} {
    %cst = arith.constant 0.000000e+00 : f32
    %0 = vector.broadcast %cst : f32 to vector<1x4x324xf32>
    %c0 = arith.constant 0 : index
    %c0_0 = arith.constant 0 : index
    %c0_1 = arith.constant 0 : index
    %1 = vector.load %arg3[%c0, %c0_0, %c0_1] : memref<1x4x324xf32, #tpu.memory_space<vmem>>, vector<1x4x324xf32>
    tpu.vector_store %arg3[%c0, %c0_0, %c0_1], %0 {strides = array<i32>} : memref<1x4x324xf32, #tpu.memory_space<vmem>>, vector<1x4x324xf32>,
    %c0_2 = arith.constant 0 : index
    %c0_3 = arith.constant 0 : index
    %c0_4 = arith.constant 0 : index
    %2 = vector.load %arg2[%c0_2, %c0_3, %c0_4] : memref<1x4x256xf32, #tpu.memory_space<vmem>>, vector<1x4x16xf32>
    %c0_5 = arith.constant 0 : index
    %c0_6 = arith.constant 0 : index
    %c19 = arith.constant 19 : index
    %3 = vector.load %arg3[%c0_5, %c0_6, %c19] : memref<1x4x324xf32, #tpu.memory_space<vmem>>, vector<1x4x16xf32>
    tpu.vector_store %arg3[%c0_5, %c0_6, %c19], %2 {strides = array<i32>} : memref<1x4x324xf32, #tpu.memory_space<vmem>>, vector<1x4x16xf32>,
    %c0_7 = arith.constant 0 : index
    %c0_8 = arith.constant 0 : index
    %c16 = arith.constant 16 : index
    %4 = vector.load %arg2[%c0_7, %c0_8, %c16] : memref<1x4x256xf32, #tpu.memory_space<vmem>>, vector<1x4x16xf32>
    %c0_9 = arith.constant 0 : index
    %c0_10 = arith.constant 0 : index
    %c37 = arith.constant 37 : index
    %5 = vector.load %arg3[%c0_9, %c0_10, %c37] : memref<1x4x324xf32, #tpu.memory_space<vmem>>, vector<1x4x16xf32>
    tpu.vector_store %arg3[%c0_9, %c0_10, %c37], %4 {strides = array<i32>} : memref<1x4x324xf32, #tpu.memory_space<vmem>>, vector<1x4x16xf32>,
    %c0_11 = arith.constant 0 : index
    %c0_12 = arith.constant 0 : index
    %c32 = arith.constant 32 : index
    %6 = vector.load %arg2[%c0_11, %c0_12, %c32] : memref<1x4x256xf32, #tpu.memory_space<vmem>>, vector<1x4x16xf32>
    %c0_13 = arith.constant 0 : index
    %c0_14 = arith.constant 0 : index
    %c55 = arith.constant 55 : index
    %7 = vector.load %arg3[%c0_13, %c0_14, %c55] : memref<1x4x324xf32, #tpu.memory_space<vmem>>, vector<1x4x16xf32>
    tpu.vector_store %arg3[%c0_13, %c0_14, %c55], %6 {strides = array<i32>} : memref<1x4x324xf32, #tpu.memory_space<vmem>>, vector<1x4x16xf32>,
    %c0_15 = arith.constant 0 : index
    %c0_16 = arith.constant 0 : index
    %c48 = arith.constant 48 : index
    %8 = vector.load %arg2[%c0_15, %c0_16, %c48] : memref<1x4x256xf32, #tpu.memory_space<vmem>>, vector<1x4x16xf32>
    %c0_17 = arith.constant 0 : index
    %c0_18 = arith.constant 0 : index
    %c73 = arith.constant 73 : index
    %9 = vector.load %arg3[%c0_17, %c0_18, %c73] : memref<1x4x324xf32, #tpu.memory_space<vmem>>, vector<1x4x16xf32>
    tpu.vector_store %arg3[%c0_17, %c0_18, %c73], %8 {strides = array<i32>} : memref<1x4x324xf32, #tpu.memory_space<vmem>>, vector<1x4x16xf32>,
    %c0_19 = arith.constant 0 : index
    %c0_20 = arith.constant 0 : index
    %c64 = arith.constant 64 : index
    %10 = vector.load %arg2[%c0_19, %c0_20, %c64] : memref<1x4x256xf32, #tpu.memory_space<vmem>>, vector<1x4x16xf32>
    %c0_21 = arith.constant 0 : index
    %c0_22 = arith.constant 0 : index
    %c91 = arith.constant 91 : index
    %11 = vector.load %arg3[%c0_21, %c0_22, %c91] : memref<1x4x324xf32, #tpu.memory_space<vmem>>, vector<1x4x16xf32>
    tpu.vector_store %arg3[%c0_21, %c0_22, %c91], %10 {strides = array<i32>} : memref<1x4x324xf32, #tpu.memory_space<vmem>>, vector<1x4x16xf32>,
    %c0_23 = arith.constant 0 : index
    %c0_24 = arith.constant 0 : index
    %c80 = arith.constant 80 : index
    %12 = vector.load %arg2[%c0_23, %c0_24, %c80] : memref<1x4x256xf32, #tpu.memory_space<vmem>>, vector<1x4x16xf32>
    %c0_25 = arith.constant 0 : index
    %c0_26 = arith.constant 0 : index
    %c109 = arith.constant 109 : index
    %13 = vector.load %arg3[%c0_25, %c0_26, %c109] : memref<1x4x324xf32, #tpu.memory_space<vmem>>, vector<1x4x16xf32>
    tpu.vector_store %arg3[%c0_25, %c0_26, %c109], %12 {strides = array<i32>} : memref<1x4x324xf32, #tpu.memory_space<vmem>>, vector<1x4x16xf32>,
    %c0_27 = arith.constant 0 : index
    %c0_28 = arith.constant 0 : index
    %c96 = arith.constant 96 : index
    %14 = vector.load %arg2[%c0_27, %c0_28, %c96] : memref<1x4x256xf32, #tpu.memory_space<vmem>>, vector<1x4x16xf32>
    %c0_29 = arith.constant 0 : index
    %c0_30 = arith.constant 0 : index
    %c127 = arith.constant 127 : index
    %15 = vector.load %arg3[%c0_29, %c0_30, %c127] : memref<1x4x324xf32, #tpu.memory_space<vmem>>, vector<1x4x16xf32>
    tpu.vector_store %arg3[%c0_29, %c0_30, %c127], %14 {strides = array<i32>} : memref<1x4x324xf32, #tpu.memory_space<vmem>>, vector<1x4x16xf32>,
    %c0_31 = arith.constant 0 : index
    %c0_32 = arith.constant 0 : index
    %c112 = arith.constant 112 : index
    %16 = vector.load %arg2[%c0_31, %c0_32, %c112] : memref<1x4x256xf32, #tpu.memory_space<vmem>>, vector<1x4x16xf32>
    %c0_33 = arith.constant 0 : index
    %c0_34 = arith.constant 0 : index
    %c145 = arith.constant 145 : index
    %17 = vector.load %arg3[%c0_33, %c0_34, %c145] : memref<1x4x324xf32, #tpu.memory_space<vmem>>, vector<1x4x16xf32>
    tpu.vector_store %arg3[%c0_33, %c0_34, %c145], %16 {strides = array<i32>} : memref<1x4x324xf32, #tpu.memory_space<vmem>>, vector<1x4x16xf32>,
    %c0_35 = arith.constant 0 : index
    %c0_36 = arith.constant 0 : index
    %c128 = arith.constant 128 : index
    %18 = vector.load %arg2[%c0_35, %c0_36, %c128] : memref<1x4x256xf32, #tpu.memory_space<vmem>>, vector<1x4x16xf32>
    %c0_37 = arith.constant 0 : index
    %c0_38 = arith.constant 0 : index
    %c163 = arith.constant 163 : index
    %19 = vector.load %arg3[%c0_37, %c0_38, %c163] : memref<1x4x324xf32, #tpu.memory_space<vmem>>, vector<1x4x16xf32>
    tpu.vector_store %arg3[%c0_37, %c0_38, %c163], %18 {strides = array<i32>} : memref<1x4x324xf32, #tpu.memory_space<vmem>>, vector<1x4x16xf32>,
    %c0_39 = arith.constant 0 : index
    %c0_40 = arith.constant 0 : index
    %c144 = arith.constant 144 : index
    %20 = vector.load %arg2[%c0_39, %c0_40, %c144] : memref<1x4x256xf32, #tpu.memory_space<vmem>>, vector<1x4x16xf32>
    %c0_41 = arith.constant 0 : index
    %c0_42 = arith.constant 0 : index
    %c181 = arith.constant 181 : index
    %21 = vector.load %arg3[%c0_41, %c0_42, %c181] : memref<1x4x324xf32, #tpu.memory_space<vmem>>, vector<1x4x16xf32>
    tpu.vector_store %arg3[%c0_41, %c0_42, %c181], %20 {strides = array<i32>} : memref<1x4x324xf32, #tpu.memory_space<vmem>>, vector<1x4x16xf32>,
    %c0_43 = arith.constant 0 : index
    %c0_44 = arith.constant 0 : index
    %c160 = arith.constant 160 : index
    %22 = vector.load %arg2[%c0_43, %c0_44, %c160] : memref<1x4x256xf32, #tpu.memory_space<vmem>>, vector<1x4x16xf32>
    %c0_45 = arith.constant 0 : index
    %c0_46 = arith.constant 0 : index
    %c199 = arith.constant 199 : index
    %23 = vector.load %arg3[%c0_45, %c0_46, %c199] : memref<1x4x324xf32, #tpu.memory_space<vmem>>, vector<1x4x16xf32>
    tpu.vector_store %arg3[%c0_45, %c0_46, %c199], %22 {strides = array<i32>} : memref<1x4x324xf32, #tpu.memory_space<vmem>>, vector<1x4x16xf32>,
    %c0_47 = arith.constant 0 : index
    %c0_48 = arith.constant 0 : index
    %c176 = arith.constant 176 : index
    %24 = vector.load %arg2[%c0_47, %c0_48, %c176] : memref<1x4x256xf32, #tpu.memory_space<vmem>>, vector<1x4x16xf32>
    %c0_49 = arith.constant 0 : index
    %c0_50 = arith.constant 0 : index
    %c217 = arith.constant 217 : index
    %25 = vector.load %arg3[%c0_49, %c0_50, %c217] : memref<1x4x324xf32, #tpu.memory_space<vmem>>, vector<1x4x16xf32>
    tpu.vector_store %arg3[%c0_49, %c0_50, %c217], %24 {strides = array<i32>} : memref<1x4x324xf32, #tpu.memory_space<vmem>>, vector<1x4x16xf32>,
    %c0_51 = arith.constant 0 : index
    %c0_52 = arith.constant 0 : index
    %c192 = arith.constant 192 : index
    %26 = vector.load %arg2[%c0_51, %c0_52, %c192] : memref<1x4x256xf32, #tpu.memory_space<vmem>>, vector<1x4x16xf32>
    %c0_53 = arith.constant 0 : index
    %c0_54 = arith.constant 0 : index
    %c235 = arith.constant 235 : index
    %27 = vector.load %arg3[%c0_53, %c0_54, %c235] : memref<1x4x324xf32, #tpu.memory_space<vmem>>, vector<1x4x16xf32>
    tpu.vector_store %arg3[%c0_53, %c0_54, %c235], %26 {strides = array<i32>} : memref<1x4x324xf32, #tpu.memory_space<vmem>>, vector<1x4x16xf32>,
    %c0_55 = arith.constant 0 : index
    %c0_56 = arith.constant 0 : index
    %c208 = arith.constant 208 : index
    %28 = vector.load %arg2[%c0_55, %c0_56, %c208] : memref<1x4x256xf32, #tpu.memory_space<vmem>>, vector<1x4x16xf32>
    %c0_57 = arith.constant 0 : index
    %c0_58 = arith.constant 0 : index
    %c253 = arith.constant 253 : index
    %29 = vector.load %arg3[%c0_57, %c0_58, %c253] : memref<1x4x324xf32, #tpu.memory_space<vmem>>, vector<1x4x16xf32>
    tpu.vector_store %arg3[%c0_57, %c0_58, %c253], %28 {strides = array<i32>} : memref<1x4x324xf32, #tpu.memory_space<vmem>>, vector<1x4x16xf32>,
    %c0_59 = arith.constant 0 : index
    %c0_60 = arith.constant 0 : index
    %c224 = arith.constant 224 : index
    %30 = vector.load %arg2[%c0_59, %c0_60, %c224] : memref<1x4x256xf32, #tpu.memory_space<vmem>>, vector<1x4x16xf32>
    %c0_61 = arith.constant 0 : index
    %c0_62 = arith.constant 0 : index
    %c271 = arith.constant 271 : index
    %31 = vector.load %arg3[%c0_61, %c0_62, %c271] : memref<1x4x324xf32, #tpu.memory_space<vmem>>, vector<1x4x16xf32>
    tpu.vector_store %arg3[%c0_61, %c0_62, %c271], %30 {strides = array<i32>} : memref<1x4x324xf32, #tpu.memory_space<vmem>>, vector<1x4x16xf32>,
    %c0_63 = arith.constant 0 : index
    %c0_64 = arith.constant 0 : index
    %c240 = arith.constant 240 : index
    %32 = vector.load %arg2[%c0_63, %c0_64, %c240] : memref<1x4x256xf32, #tpu.memory_space<vmem>>, vector<1x4x16xf32>
    %c0_65 = arith.constant 0 : index
    %c0_66 = arith.constant 0 : index
    %c289 = arith.constant 289 : index
    %33 = vector.load %arg3[%c0_65, %c0_66, %c289] : memref<1x4x324xf32, #tpu.memory_space<vmem>>, vector<1x4x16xf32>
    tpu.vector_store %arg3[%c0_65, %c0_66, %c289], %32 {strides = array<i32>} : memref<1x4x324xf32, #tpu.memory_space<vmem>>, vector<1x4x16xf32>,
    return
  }
  func.func @transform_0(%arg0: i32, %arg1: i32) -> (i32, i32, i32) {
    %c0_i32 = arith.constant 0 : i32
    %c0_i32_0 = arith.constant 0 : i32
    return %arg0, %arg1, %c0_i32 : i32, i32, i32
  }
  func.func @transform_1(%arg0: i32, %arg1: i32) -> (i32, i32, i32) {
    %c0_i32 = arith.constant 0 : i32
    %c0_i32_0 = arith.constant 0 : i32
    return %arg0, %arg1, %c0_i32 : i32, i32, i32
  }
}

</mosaic_0001>

<bundles_post_ra>
// kernel: tpu_custom_call.1
= control target key start
LH: loop header
LB: loop body
LE: loop exit
PB: predicated region body
PF: predicated region fallthrough
CT: control target
= control target key end

     0   :  { %6 = vsyncpa [#allocation3], 0  ;;  %s790_s0 = inlined_call_operand.hbm [shape: f32[2,4,256], index: 0, kind: input, shape index: {}]   ;;  %s791_s1 = inlined_call_operand.hbm [shape: f32[2,4,324], index: 1, kind: output, shape index: {}]  }
   0x1   :  { %8 = vsyncpa [#allocation3 + $0x1], 0 }
   0x2   :  { %9 = vsyncpa [#allocation4], 0 }
   0x3   :  { %11 = vsyncpa [#allocation4 + $0x1], 0  ;;  %s610_s6 = smov 0   ;;  %s612_s7 = smov 0  }
   0x4   :  { %s614_s8 = smov 0   ;;  %s616_s9 = smov 0  }
   0x5   :  { %s618_s10 = smov 0   ;;  %s620_s11 = smov 0  }
   0x6 LB: > { %s377_s12 = sadd.s32 4294967295, %s579_s11   ;;  %s378_s13 = sadd.s32 4294967294, %s579_s11   ;;  %s579_s11 = sphi %s620_s11, %s17_s11   ;;  %s575_s10 = sphi %s618_s10, %s803_s10   ;;  %s571_s9 = sphi %s616_s9, %s802_s9   ;;  %s567_s8 = sphi %s614_s8, %s801_s8   ;;  %s563_s7 = sphi %s612_s7, %s800_s7   ;;  %s559_s6 = sphi %s610_s6, %s799_s6  }
   0x7   : > { %s29_s14 = sadd.s32 1, %s575_s10  ;;  %s38_s15 = sadd.s32 1, %s567_s8 }
   0x8   : > { %p31_p0 = scmp.ge.s32.totalorder %s29_s14, 2  ;;  %p45_p1 = scmp.ne.s32.totalorder %s567_s8, %s563_s7 }
   0x9   : > { %p46_p2 = scmp.eq.s32.totalorder %s579_s11, 0  ;;  %p51_p3 = scmp.ne.s32.totalorder %s563_s7, %s559_s6 }
   0xa   : > { %s805_s14 = smov (%p31_p0, %s29_s14), 0  ;;  %p52_p5 = scmp.eq.s32.totalorder %s377_s12, 0 }
   0xb   : > { %p651_p4 = por %p46_p2, %p45_p1  ;;  %s33_s17 = ssub.s32 %s575_s10, %s805_s14 }
   0xc   : > { %p77_p6 = scmp.eq.s32.totalorder %s377_s12, 1  ;;  %p36_p7 = scmp.eq.s32.totalorder %s33_s17, 0 }
   0xd   : > { %p657_p8 = por %p52_p5, %p51_p3  ;;  %p83_p10 = scmp.eq.s32.totalorder %s378_s13, 1 }
   0xe   : > { %p661_p9 = por %p77_p6, %p45_p1  ;;  %p404_p13 = scmp.lt.s32.totalorder %s579_s11, 2 }
   0xf   : > { %s666_s20 = scalar_select %p36_p7, %s567_s8, %s38_s15  }
  0x10   : > { %p668_p11 = por %p83_p10, %p51_p3  ;;  %s103_s22 = sand.u32 1, %s567_s8  }
  0x11   : > { %s381_s23 = sshll.u32 %s103_s22, 3  ;;  %s389_s24 = sshll.u32 %s575_s10, 7 }
  0x12   : > { %s795_s21 = scalar_select %p668_p11, 1, 0 }
  0x13   : > { %s115_s27 = scalar_lea.hbm %s790_s0, %s389_s24  ;;  %s107_s28 = scalar_lea.vmem [#allocation2], %s381_s23 }
  0x14   : > { %s117_s29 = sshll.u32 %s107_s28, 4  ;;  %p681_p0 = pnand %p404_p13, %p651_p4  ;;  %s118_s29 = int_to_ptr.vmem [resolvable:$true] %s117_s29 }
  0x15   : > { %p384_p1 = scmp.ge.s32.totalorder %s579_s11, 1  ;;  %p122_p2 = scmp.lt.s32.totalorder %s579_s11, 3 }
  0x16   : > { %s104_s2 = scalar_lea.sflag [#allocation3], %s103_s22  ;;  %p473_p3 = pneg %p681_p0 }
  0x17   : > { %s484_s3 = scalar_lea.vmem %s118_s29, 128  ;;  %s581_s4 = smov [#allocation2]  }
  0x18   : > { %p485_p5 = scmp.ne.s32.totalorder %s118_s29, %s484_s3  ;;  %s489_s5 = sshll.u32 %s581_s4, 4  ;;  %s490_s5 = int_to_ptr.vmem [resolvable:$false] %s489_s5 }
  0x19   : > { %s491_s12 = scalar_lea.vmem %s490_s5, 256  ;;  %p492_p10 = scmp.lt.s32.totalorder %s118_s29, %s490_s5 }
  0x1a   : > { %p487_p6 = pnand %p485_p5, %p473_p3  ;;  %p493_p12 = scmp.lt.s32.totalorder %s491_s12, %s484_s3 }
  0x1c   : > { %p488_p7 = pneg %p487_p6  ;;  %p494_p4 = por %p493_p12, %p492_p10 }
  0x1e   : > { %p495_p13 = pnand %p494_p4, %p488_p7 }
  0x20   : > { %498 = shalt.err (!%p495_p13)
}
  0x21   : > { %399 = dma.hbm_to_vmem [thread:$0]  (!%p681_p0), %s115_s27, 128, %s118_s29, %s104_s2  }
  0x22   : > { %p123_p11 = pnand %p384_p1, %p122_p2 }
  0x23   : > { %s696_s13 = sand.u32 (!%p123_p11), 1, %s563_s7  }
  0x24   : > { %126 = sbr.rel (%p123_p11) target bundleno = 201 (0xc9), region = 24  ;;  %s385_s15 = sshll.u32 (!%p123_p11), %s696_s13, 3 }
  0x25   : > { %s129_s16 = scalar_lea.sflag (!%p123_p11), [#allocation3], %s696_s13  ;;  %s700_s17 = scalar_lea.vmem (!%p123_p11), [#allocation2], %s385_s15 }
  0x29   : > { %550 = dma.done.wait (%p657_p8), %s129_s16, 128  }
  0x2a   : > { %552 = vsyncadd (%p657_p8), %s129_s16, 4294967168  ;;  %v168_v0 = vld [vmem:[%s700_s17] sm:$0xf]  ;;  %s582_s22 = smov 23   ;;  %s583_s23 = smov 19   ;;  %vm152_vm0 = vcmask 551936  }
  0x2b   : > { %v154_v1 = vld [vmem:[%s700_s17] sm:$0xf]  ;;  %170 = vrot.lane.b32.xlu1 %v168_v0, %s582_s22  ;;  %s584_s24 = smov 25   ;;  %s585_s18 = smov 21   ;;  %v586_v6 = vmov 0.0   ;;  %vm159_vm1 = vcmask 281752  }
  0x2c   : > { %156 = vrot.lane.b32.xlu0 %v154_v1, %s583_s23  ;;  %v175_v2 = vld [vmem:[%s700_s17] sm:$0xf]  ;;  %s390_s25 = smul.u32 12, %s696_s13  ;;  %s587_s27 = smov 27   ;;  %v222_v9 = vld [vmem:[%s700_s17 + $0x4] sm:$0xf] }
  0x2d   : > { %v161_v3 = vld [vmem:[%s700_s17] sm:$0xf]  ;;  %s588_s28 = smov 31   ;;  %s589_s29 = smov 33   ;;  %v215_v10 = vld [vmem:[%s700_s17 + $0x4] sm:$0xf] }
  0x2e   : > { %v182_v4 = vld [vmem:[%s700_s17] sm:$0xf]  ;;  %s713_s26 = scalar_lea.vmem [#allocation5], %s390_s25  ;;  %s590_s30 = smov 29   ;;  %v250_v11 = vld [vmem:[%s700_s17 + $0x4] sm:$0xf] }
  0x2f   : > { %177 = vrot.lane.b32.xlu1 %v175_v2, %s584_s24  ;;  %v196_v5 = vld [vmem:[%s700_s17] sm:$0xf]  ;;  %151 = vst [vmem:[%s713_s26] sm:$0xff] %v586_v6  ;;  %153 = vst.msk [vmem:[%s713_s26 + $0x8] sm:$0xf] %vm152_vm0, %v586_v6  ;;  %s591_s2 = smov 37   ;;  %s592_s3 = smov 35  }
  0x30   : > { %163 = vrot.lane.b32.xlu0 %v161_v3, %s585_s18  ;;  %v208_v7 = vld [vmem:[%s700_s17] sm:$0xf]  ;;  %v229_v12 = vld [vmem:[%s700_s17 + $0x4] sm:$0xf]  ;;  %s593_s4 = smov 45   ;;  %s594_s5 = smov 39  }
  0x31   : > { %v189_v8 = vld [vmem:[%s700_s17] sm:$0xf]  ;;  %v236_v13 = vld [vmem:[%s700_s17 + $0x4] sm:$0xf]  ;;  %s595_s12 = smov 41   ;;  %s596_s15 = smov 43  }
  0x32   : > { %v243_v14 = vld [vmem:[%s700_s17 + $0x4] sm:$0xf]  ;;  %s597_s16 = smov 47   ;;  %s598_s22 = smov 49   ;;  %vm166_vm2 = vcmask 429352   ;;  %vm173_vm3 = vcmask 576952  }
  0x33   : > { %184 = vrot.lane.b32.xlu1 %v182_v4, %s587_s27  ;;  %v262_v15 = vld [vmem:[%s700_s17 + $0x4] sm:$0xf]  ;;  %vm180_vm4 = vcmask 724552   ;;  %vm187_vm5 = vcmask 872152   ;;  %vm204_vm6 = vcmask 1044472   ;;  %vm205_vm7 = vcmask 121860  }
  0x34   : > { %198 = vrot.lane.b32.xlu0 %v196_v5, %s588_s28  ;;  %v269_v16 = vld [vmem:[%s700_s17 + $0x4] sm:$0xf]  ;;  %vm201_vm8 = vcmask 252928   ;;  %vm194_vm9 = vcmask 1019752   ;;  %vm206_vm10 = vmor %vm205_vm7, %vm204_vm6  ;;  %vm213_vm11 = vcmask 265352   ;;  %vm220_vm12 = vcmask 412952  }
  0x35   : > { %vm227_vm13 = vcmask 560552   ;;  %vm234_vm14 = vcmask 708152   ;;  %vm258_vm15 = vcmask 1044456   ;;  %vm259_vm0 = vcmask 105476   ;;  %s391_s17 = smul.u32 192, %s571_s9  ;;  %s293_s23 = sshll.u32 %s713_s26, 4  ;;  %s294_s23 = int_to_ptr.vmem [resolvable:$true] %s293_s23 }
  0x36   : > { %vm274_vm6 = vcmask 396552   ;;  %s277_s27 = scalar_lea.sflag [#allocation4], %s696_s13  ;;  %s499_s9 = scalar_lea.vmem %s294_s23, 192 }
  0x37   : > { %210 = vrot.lane.b32.xlu1 %v208_v7, %s589_s29  ;;  %s746_s25 = scalar_lea.hbm %s791_s1, %s391_s17  ;;  %p500_p8 = scmp.ne.s32.totalorder %s294_s23, %s499_s9 }
  0x38   : > { %191 = vrot.lane.b32.xlu0 %v189_v8, %s590_s30  ;;  %s599_s28 = smov [#allocation5]  }
  0x39   : > { %p501_p11 = pnand %p500_p8, %p661_p9  ;;  %s503_s29 = sshll.u32 %s599_s28, 4  ;;  %s504_s29 = int_to_ptr.vmem [resolvable:$false] %s503_s29 }
  0x3a   : > { %s505_s30 = scalar_lea.vmem %s504_s29, 384  ;;  %p506_p0 = scmp.lt.s32.totalorder %s294_s23, %s504_s29 }
  0x3b   : > { %224 = vrot.lane.b32.xlu1 %v222_v9, %s591_s2  ;;  %p502_p12 = pneg %p501_p11  ;;  %p507_p1 = scmp.lt.s32.totalorder %s505_s30, %s499_s9 }
  0x3c   : > { %217 = vrot.lane.b32.xlu0 %v215_v10, %s592_s3 }
  0x3d   : > { %p508_p2 = por %p507_p1, %p506_p0 }
  0x3f   : > { %252 = vrot.lane.b32.xlu1 %v250_v11, %s593_s4  ;;  %p509_p3 = pnand %p508_p2, %p502_p12 }
  0x40   : > { %231 = vrot.lane.b32.xlu0 %v229_v12, %s594_s5 }
  0x43   : > { %245 = vrot.lane.b32.xlu1 %v243_v14, %s596_s15 }
  0x44   : > { %238 = vrot.lane.b32.xlu0 %v236_v13, %s595_s12 }
  0x47   : > { %271 = vrot.lane.b32.xlu1 %v269_v16, %s598_s22 }
  0x48   : > { %264 = vrot.lane.b32.xlu0 %v262_v15, %s597_s16 }
  0x9d   : > { %v171_v17 = vpop.permute.xlu1 %170 }
  0x9e   : > { %v157_v18 = vpop.permute.xlu0 %156 }
  0x9f   : > { %160 = vst.msk [vmem:[%s713_s26] sm:$0xf] %vm159_vm1, %v157_v18  ;;  %vm241_vm1 = vcmask 855752  }
  0xa1   : > { %v178_v19 = vpop.permute.xlu1 %177 }
  0xa2   : > { %v164_v20 = vpop.permute.xlu0 %163 }
  0xa3   : > { %167 = vst.msk [vmem:[%s713_s26] sm:$0xf] %vm166_vm2, %v164_v20  ;;  %vm255_vm2 = vcmask 367616  }
  0xa4   : > { %174 = vst.msk [vmem:[%s713_s26] sm:$0xf] %vm173_vm3, %v171_v17  ;;  %vm248_vm3 = vcmask 1003352  }
  0xa5   : > { %181 = vst.msk [vmem:[%s713_s26] sm:$0xf] %vm180_vm4, %v178_v19  ;;  %v185_v21 = vpop.permute.xlu1 %184  ;;  %vm260_vm4 = vmor %vm259_vm0, %vm258_vm15 }
  0xa6   : > { %v199_v22 = vpop.permute.xlu0 %198  ;;  %188 = vst.msk [vmem:[%s713_s26] sm:$0xf] %vm187_vm5, %v185_v21  ;;  %vm267_vm5 = vcmask 248952  }
  0xa7   : > { %v200_v23 = vrot.slane %v199_v22, 4 }
  0xa9   : > { %v211_v24 = vpop.permute.xlu1 %210  ;;  %v202_v26 = vsel %vm201_vm8, %v200_v23, %v199_v22 }
  0xaa   : > { %v192_v25 = vpop.permute.xlu0 %191 }
  0xab   : > { %195 = vst.msk [vmem:[%s713_s26] sm:$0xf] %vm194_vm9, %v192_v25 }
  0xac   : > { %207 = vst.msk [vmem:[%s713_s26] sm:$0xff] %vm206_vm10, %v202_v26 }
  0xad   : > { %214 = vst.msk [vmem:[%s713_s26 + $0x4] sm:$0xf] %vm213_vm11, %v211_v24  ;;  %v225_v27 = vpop.permute.xlu1 %224 }
  0xae   : > { %v218_v28 = vpop.permute.xlu0 %217 }
  0xaf   : > { %221 = vst.msk [vmem:[%s713_s26 + $0x4] sm:$0xf] %vm220_vm12, %v218_v28 }
  0xb0   : > { %228 = vst.msk [vmem:[%s713_s26 + $0x4] sm:$0xf] %vm227_vm13, %v225_v27 }
  0xb1   : > { %v253_v29 = vpop.permute.xlu1 %252 }
  0xb2   : > { %v232_v30 = vpop.permute.xlu0 %231  ;;  %v254_v31 = vrot.slane %v253_v29, 4 }
  0xb3   : > { %235 = vst.msk [vmem:[%s713_s26 + $0x4] sm:$0xf] %vm234_vm14, %v232_v30 }
  0xb4   : > { %v256_v34 = vsel %vm255_vm2, %v254_v31, %v253_v29 }
  0xb5   : > { %v246_v33 = vpop.permute.xlu1 %245 }
  0xb6   : > { %v239_v32 = vpop.permute.xlu0 %238 }
  0xb7   : > { %242 = vst.msk [vmem:[%s713_s26 + $0x4] sm:$0xf] %vm241_vm1, %v239_v32 }
  0xb8   : > { %249 = vst.msk [vmem:[%s713_s26 + $0x4] sm:$0xf] %vm248_vm3, %v246_v33 }
  0xb9   : > { %261 = vst.msk [vmem:[%s713_s26 + $0x4] sm:$0xff] %vm260_vm4, %v256_v34  ;;  %v272_v36 = vpop.permute.xlu1 %271 }
  0xba   : > { %v265_v35 = vpop.permute.xlu0 %264 }
  0xbb   : > { %268 = vst.msk [vmem:[%s713_s26 + $0x8] sm:$0xf] %vm267_vm5, %v265_v35 }
  0xbc   : > { %275 = vst.msk [vmem:[%s713_s26 + $0x8] sm:$0xf] %vm274_vm6, %v272_v36 }
  0xbd   : > { %512 = shalt.err (!%p509_p3)
}
  0xbe   : > { %s513_s26 = scalar_lea.hbm %s746_s25, 192  ;;  %s517_s3 = scalar_lea.hbm %s791_s1, 384 }
  0xbf   : > { %p514_p5 = scmp.ne.s32.totalorder %s746_s25, %s513_s26  ;;  %p518_p10 = scmp.lt.s32.totalorder %s746_s25, %s791_s1 }
  0xc0   : > { %p519_p4 = scmp.lt.s32.totalorder %s517_s3, %s513_s26 }
  0xc1   : > { %p515_p6 = pnand %p514_p5, %p661_p9 }
  0xc2   : > { %p520_p13 = por %p519_p4, %p518_p10 }
  0xc3   : > { %p516_p7 = pneg %p515_p6 }
  0xc5   : > { %p521_p8 = pnand %p520_p13, %p516_p7 }
  0xc7   : > { %524 = shalt.err (!%p521_p8)
}
  0xc8   : > { %394 = dma.vmem_to_hbm [thread:$0]  (%p661_p9), %s294_s23, 192, %s746_s25, %s277_s27  }
  0xc9 PF: > { %s305_s12 = sand.u32 1, %s559_s6   ;;  %p797_p11 = scmp.ne.s32.totalorder %s795_s21, 0 }
  0xca   : > { %p798_p12 = scmp.ge.s32.totalorder %s579_s11, 2  ;;  %s306_s15 = scalar_lea.sflag [#allocation4], %s305_s12 }
  0xcc   : > { %p401_p0 = pnand %p798_p12, %p797_p11 }
  0xce   : > { %p402_p1 = pneg %p401_p0 }
  0xd0   : > { %554 = dma.done.wait (%p402_p1), %s306_s15, 192  }
  0xd1   : > { %556 = vsyncadd (%p402_p1), %s306_s15, 4294967104  ;;  %s17_s11 = sadd.s32 1, %s579_s11   ;;  %s799_s6 = smov %s563_s7 }
  0xd2   : > { %p14_p2 = scmp.ge.s32.totalorder %s17_s11, 4   ;;  %s800_s7 = smov %s567_s8 }
  0xd3   : > { %s801_s8 = smov %s666_s20  ;;  %s802_s9 = smov %s575_s10 }
  0xd4   : > { %s803_s10 = smov %s805_s14  ;;  %16 = sbr.rel (!%p14_p2) target bundleno = 6 (0x6), region = 69 }
  0xd9   :  { %311 = vsyncpa [#allocation3], 1 }
  0xda   :  { %313 = vsyncpa [#allocation3 + $0x1], 1 }
  0xdb   :  { %314 = vsyncpa [#allocation4], 1 }
  0xdc   :  { %316 = vsyncpa [#allocation4 + $0x1], 1 }

</bundles_post_ra>
